<compile_context>
chip_gen: v7x
topology: tpu7x:2x2x1
jax: 0.10.0
libtpu: 0.0.40
codegen_flags: <defaults>
</compile_context>

<pallas_src>
import math
import jax
import jax.numpy as jnp
from jax import lax
from jax.experimental import pallas as pl
from jax.experimental.pallas import tpu as pltpu

THRESHOLD = 1.0  # config.threshold
BN_EPS = 1e-5


# ----------------------------------------------------------------------------
# helpers
# ----------------------------------------------------------------------------
def _largest_divisor(n, target, align=1):
    """Largest divisor of n that is <= target and a multiple of `align` (or == n)."""
    for d in range(min(n, target), 0, -1):
        if n % d == 0 and (d % align == 0 or d == n):
            return d
    return n


# ----------------------------------------------------------------------------
# Kernel 1: fused Linear + folded (eval-mode) BatchNorm over ALL time steps.
#   y = x @ (W^T * bn_scale) + bn_shift,  x/(W^T*scale) in bf16, accumulate f32.
# ----------------------------------------------------------------------------
def linear_bn_kernel(x_ref, w_ref, b_ref, o_ref):
    o_ref[...] = jnp.dot(x_ref[...], w_ref[...],
                         preferred_element_type=jnp.float32) + b_ref[...]


def linear_bn(x2d, w_scaled, shift, *, row_block=256):
    R, IN = x2d.shape
    H = w_scaled.shape[1]
    rb = _largest_divisor(R, row_block, align=8)
    grid_spec = pltpu.PrefetchScalarGridSpec(
        num_scalar_prefetch=0,
        grid=(R // rb,),
        in_specs=[
            pl.BlockSpec((rb, IN), lambda r: (r, 0)),   # activations (bf16)
            pl.BlockSpec((IN, H), lambda r: (0, 0)),    # BN-folded W^T (bf16)
            pl.BlockSpec((1, H), lambda r: (0, 0)),     # BN shift (f32)
        ],
        out_specs=pl.BlockSpec((rb, H), lambda r: (r, 0)),
    )
    return pl.pallas_call(
        linear_bn_kernel,
        out_shape=jax.ShapeDtypeStruct((R, H), jnp.float32),
        grid_spec=grid_spec,
        compiler_params=pltpu.CompilerParams(
            dimension_semantics=("parallel",)),
    )(x2d, w_scaled, shift)


# ----------------------------------------------------------------------------
# Kernel 2: RadLIF recurrence, time-chunked (grid axis = time chunks, sequential).
# ----------------------------------------------------------------------------
def radlif_kernel(wx_ref, v_ref, par_ref, u0_ref, w0_ref, s0_ref,
                  s_out_ref, rate_ref,
                  ut, wt, st):
    c = pl.program_id(0)

    @pl.when(c == 0)
    def _():
        ut[...] = u0_ref[...]
        wt[...] = w0_ref[...]
        st[...] = s0_ref[...]
        rate_ref[...] = jnp.zeros_like(rate_ref)

    # Hoisted once per chunk: packed per-feature params and the recurrent matrix.
    par = par_ref[...]                       # (8, H) f32
    alpha = par[0:1, :]
    one_m_alpha = par[1:2, :]                # precomputed (1 - alpha)
    beta = par[2:3, :]
    a = par[3:4, :]
    b = par[4:5, :]
    v = v_ref[...]                           # (H, H) bf16, masked & zero-diagonal

    n_steps = wx_ref.shape[0]

    def step(i, rate_acc):
        u_old = ut[...]
        s_old = st[...]
        # Adaptation variable (uses OLD u, s).
        w_new = beta * wt[...] + a * u_old + b * s_old
        # Recurrent contribution (sparch: torch.matmul(st, V), no transpose).
        rec = jnp.dot(s_old.astype(v.dtype), v,
                      preferred_element_type=jnp.float32)
        # Membrane update.
        u_new = alpha * (u_old - s_old) + one_m_alpha * (wx_ref[i] + rec - w_new)
        # Spike (surrogate-gradient forward = Heaviside).
        s_new = (u_new > THRESHOLD).astype(jnp.float32)
        ut[...] = u_new
        wt[...] = w_new
        st[...] = s_new
        s_out_ref[i] = s_new.astype(s_out_ref.dtype)
        return rate_acc + jnp.sum(s_new, axis=0, keepdims=True)

    rate = lax.fori_loop(0, n_steps, step,
                         jnp.zeros(rate_ref.shape, jnp.float32),
                         unroll=True)
    rate_ref[...] += rate


def radlif_layer(wx_tm, v_eff, par, u0, w0, s0, *, time_chunk=16):
    T, B, H = wx_tm.shape
    tc = _largest_divisor(T, time_chunk)
    inv = lambda c: (0, 0)
    grid_spec = pltpu.PrefetchScalarGridSpec(
        num_scalar_prefetch=0,
        grid=(T // tc,),
        in_specs=[
            pl.BlockSpec((tc, B, H), lambda c: (c, 0, 0)),   # Wx chunk (f32)
            pl.BlockSpec((H, H), inv),                       # V (bf16)
            pl.BlockSpec((8, H), inv),                       # packed params (f32)
            pl.BlockSpec((B, H), inv),                       # u0
            pl.BlockSpec((B, H), inv),                       # w0
            pl.BlockSpec((B, H), inv),                       # s0
        ],
        out_specs=[
            pl.BlockSpec((tc, B, H), lambda c: (c, 0, 0)),   # spikes (bf16)
            pl.BlockSpec((1, H), inv),                       # resident spike-sum
        ],
        scratch_shapes=[pltpu.VMEM((B, H), jnp.float32)] * 3,
    )
    return pl.pallas_call(
        radlif_kernel,
        out_shape=(jax.ShapeDtypeStruct((T, B, H), jnp.bfloat16),
                   jax.ShapeDtypeStruct((1, H), jnp.float32)),
        grid_spec=grid_spec,
        compiler_params=pltpu.CompilerParams(
            dimension_semantics=("arbitrary",)),
    )(wx_tm, v_eff, par, u0, w0, s0)


# ----------------------------------------------------------------------------
# Kernel 3: Readout (non-spiking LIF), time-chunked, softmax accumulated in VMEM.
# ----------------------------------------------------------------------------
def readout_kernel(wx_ref, par_ref, u0_ref, out_ref, ut):
    c = pl.program_id(0)

    @pl.when(c == 0)
    def _():
        ut[...] = u0_ref[...]
        out_ref[...] = jnp.zeros_like(out_ref)

    par = par_ref[...]
    alpha = par[0:1, :]
    one_m_alpha = par[1:2, :]
    n_steps = wx_ref.shape[0]

    def step(i, acc):
        u_new = alpha * ut[...] + one_m_alpha * wx_ref[i]
        ut[...] = u_new
        # softmax over feature axis (dim=1 in the torch code)
        m = jnp.max(u_new, axis=-1, keepdims=True)
        e = jnp.exp(u_new - m)
        return acc + e * pl.reciprocal(jnp.sum(e, axis=-1, keepdims=True),
                                       approx=True)

    acc = lax.fori_loop(0, n_steps, step,
                        jnp.zeros(out_ref.shape, jnp.float32),
                        unroll=True)
    out_ref[...] += acc


def readout_layer(wx_tm, par, u0, *, time_chunk=16):
    T, B, O = wx_tm.shape
    tc = _largest_divisor(T, time_chunk)
    inv = lambda c: (0, 0)
    grid_spec = pltpu.PrefetchScalarGridSpec(
        num_scalar_prefetch=0,
        grid=(T // tc,),
        in_specs=[
            pl.BlockSpec((tc, B, O), lambda c: (c, 0, 0)),   # Wx chunk (f32)
            pl.BlockSpec((8, O), inv),                       # packed params
            pl.BlockSpec((B, O), inv),                       # u0
        ],
        out_specs=pl.BlockSpec((B, O), inv),                 # resident accumulator
        scratch_shapes=[pltpu.VMEM((B, O), jnp.float32)],
    )
    return pl.pallas_call(
        readout_kernel,
        out_shape=jax.ShapeDtypeStruct((B, O), jnp.float32),
        grid_spec=grid_spec,
        compiler_params=pltpu.CompilerParams(
            dimension_semantics=("arbitrary",)),
    )(wx_tm, par, u0)


# ----------------------------------------------------------------------------
# Parameter init (matches the PyTorch __init__ distributions, seeded)
# ----------------------------------------------------------------------------
def init_radlif_params(key, in_size, hidden, batch):
    ks = jax.random.split(key, 8)
    alpha_lim = (math.exp(-1 / 5), math.exp(-1 / 25))
    beta_lim = (math.exp(-1 / 30), math.exp(-1 / 120))
    bound = 1.0 / math.sqrt(in_size)
    wT = jax.random.uniform(ks[0], (in_size, hidden), minval=-bound, maxval=bound)
    V = jax.nn.initializers.orthogonal()(ks[1], (hidden, hidden), jnp.float32)
    V = V * (1.0 - jnp.eye(hidden))  # fill_diagonal_(0)
    alpha = jax.random.uniform(ks[2], (1, hidden), minval=alpha_lim[0], maxval=alpha_lim[1])
    beta = jax.random.uniform(ks[3], (1, hidden), minval=beta_lim[0], maxval=beta_lim[1])
    a = jax.random.uniform(ks[4], (1, hidden), minval=-1.0, maxval=1.0)
    b = jax.random.uniform(ks[5], (1, hidden), minval=0.0, maxval=2.0)
    # BatchNorm1d(hidden) eval semantics with fresh running stats.
    scale = jnp.full((1, hidden), 1.0 / math.sqrt(1.0 + BN_EPS), jnp.float32)
    shift = jnp.zeros((1, hidden), jnp.float32)
    # torch.rand initial states (deterministic jax.random equivalent)
    u0 = jax.random.uniform(ks[6], (batch, hidden))
    w0 = jax.random.uniform(ks[7], (batch, hidden))
    s0 = jax.random.uniform(jax.random.fold_in(ks[7], 1), (batch, hidden))
    return dict(wT=wT, V=V, alpha=alpha, beta=beta, a=a, b=b,
                scale=scale, shift=shift, u0=u0, w0=w0, s0=s0)


def init_readout_params(key, in_size, out_size, batch):
    ks = jax.random.split(key, 3)
    alpha_lim = (math.exp(-1 / 5), math.exp(-1 / 25))
    bound = 1.0 / math.sqrt(in_size)
    wT = jax.random.uniform(ks[0], (in_size, out_size), minval=-bound, maxval=bound)
    alpha = jax.random.uniform(ks[1], (1, out_size), minval=alpha_lim[0], maxval=alpha_lim[1])
    scale = jnp.full((1, out_size), 1.0 / math.sqrt(1.0 + BN_EPS), jnp.float32)
    shift = jnp.zeros((1, out_size), jnp.float32)
    u0 = jax.random.uniform(ks[2], (batch, out_size))
    return dict(wT=wT, alpha=alpha, scale=scale, shift=shift, u0=u0)


# ----------------------------------------------------------------------------
# Full SNN forward
# ----------------------------------------------------------------------------
def snn_forward(params, x, masks, *, time_chunk=16):
    """x: (B, T, IN) float32; masks: list of (H,H) masks for hidden layers."""
    B, T, _ = x.shape
    x_tm = jnp.transpose(x, (1, 0, 2))                         # (T, B, IN)
    cur = x_tm.astype(jnp.bfloat16)                            # MXU operand dtype

    rate_means = []
    spikes_tm = []
    for i, p in enumerate(params["hidden"]):
        H = p["wT"].shape[1]
        # Fold BN scale into the weight columns; shift stays as a bias.
        w_folded = (p["wT"] * p["scale"]).astype(jnp.bfloat16)
        wx = linear_bn(cur.reshape(T * B, cur.shape[-1]),
                       w_folded, p["shift"]).reshape(T, B, H)
        v_eff = (p["V"] * masks[i]).astype(jnp.bfloat16)       # recurrence: s @ V
        par = jnp.concatenate(
            [p["alpha"], 1.0 - p["alpha"], p["beta"], p["a"], p["b"],
             jnp.zeros((3, H), jnp.float32)], axis=0)          # (8, H) packed
        s_tm, rate_sum = radlif_layer(wx, v_eff, par,
                                      p["u0"], p["w0"], p["s0"],
                                      time_chunk=time_chunk)
        spikes_tm.append(s_tm)
        rate_means.append(rate_sum[0] / (T * B))               # mean over (time, batch)
        cur = s_tm                                             # bf16 spikes feed next layer

    rp = params["readout"]
    O = rp["wT"].shape[1]
    w_folded = (rp["wT"] * rp["scale"]).astype(jnp.bfloat16)
    wx = linear_bn(cur.reshape(T * B, cur.shape[-1]),
                   w_folded, rp["shift"]).reshape(T, B, O)
    par = jnp.concatenate([rp["alpha"], 1.0 - rp["alpha"],
                           jnp.zeros((6, O), jnp.float32)], axis=0)
    out = readout_layer(wx, par, rp["u0"], time_chunk=time_chunk)   # (B, O)

    firing_rates = jnp.concatenate(rate_means, axis=0)         # (num_hidden_layers * H,)
    # Keep the module's (B, T, H) output contract (pure layout plumbing).
    all_spikes = [jnp.transpose(s, (1, 0, 2)).astype(jnp.float32) for s in spikes_tm]
    return out, firing_rates, all_spikes


# ----------------------------------------------------------------------------
# Demo
# ----------------------------------------------------------------------------
if __name__ == "__main__":
    # Small, TPU-friendly shapes: B multiple of 8, hidden = 128 (lane-dense).
    B, T, NB_IN, NB_HID, NB_OUT = 8, 16, 96, 128, 20
    NB_LAYERS = 3  # 2 RadLIF hidden layers + readout

    root = jax.random.PRNGKey(0)
    k_x, k_l0, k_l1, k_ro = jax.random.split(root, 4)

    # Spike-like input (batch, time, feat)
    x = (jax.random.uniform(k_x, (B, T, NB_IN)) < 0.3).astype(jnp.float32)

    params = {
        "hidden": [
            init_radlif_params(k_l0, NB_IN, NB_HID, B),
            init_radlif_params(k_l1, NB_HID, NB_HID, B),
        ],
        "readout": init_readout_params(k_ro, NB_HID, NB_OUT, B),
    }
    masks = [jnp.ones((NB_HID, NB_HID), jnp.float32)] * (NB_LAYERS - 1)

    out, firing_rates, all_spikes = snn_forward(params, x, masks, time_chunk=8)
    jax.block_until_ready(out)
    jax.block_until_ready(firing_rates)
    jax.block_until_ready(all_spikes)

    assert out.shape == (B, NB_OUT)
    assert firing_rates.shape == ((NB_LAYERS - 1) * NB_HID,)
    assert all(s.shape == (B, T, NB_HID) for s in all_spikes)
    print("KERNEL_OK")
</pallas_src>

<mosaic_0001>
module attributes {stable_mosaic.version = 11 : i64} {
  func.func @linear_bn_kernel(%arg0: i32, %arg1: memref<128x96xbf16, #tpu.memory_space<vmem>>, %arg2: memref<96x128xbf16, #tpu.memory_space<vmem>>, %arg3: memref<1x128xf32, #tpu.memory_space<vmem>>, %arg4: memref<128x128xf32, #tpu.memory_space<vmem>>) attributes {dimension_semantics = [#tpu.dimension_semantics<parallel>], iteration_bounds = array<i64: 1>, scalar_prefetch = 0 : i64, scratch_operands = 0 : i64, tpu.core_type = #tpu.core_type<tc>, window_params = [{transform_indices = @transform_0, window_bounds = array<i64: 128, 96>}, {pipeline_mode = #tpu.pipeline_mode<synchronous>, transform_indices = @transform_1, window_bounds = array<i64: 96, 128>}, {pipeline_mode = #tpu.pipeline_mode<synchronous>, transform_indices = @transform_2, window_bounds = array<i64: 1, 128>}, {transform_indices = @transform_3, window_bounds = array<i64: 128, 128>}]} {
    %c0 = arith.constant 0 : index
    %c0_0 = arith.constant 0 : index
    %0 = vector.load %arg1[%c0, %c0_0] : memref<128x96xbf16, #tpu.memory_space<vmem>>, vector<128x96xbf16>
    %c0_1 = arith.constant 0 : index
    %c0_2 = arith.constant 0 : index
    %1 = vector.load %arg2[%c0_1, %c0_2] : memref<96x128xbf16, #tpu.memory_space<vmem>>, vector<96x128xbf16>
    %cst = arith.constant dense<0.000000e+00> : vector<128x128xf32>
    %2 = tpu.matmul %0, %1, %cst {dimension_numbers = #tpu.dot_dimension_numbers<[1], [0], [0], [1], [0, 0, 1, 1], [], []>} : vector<128x96xbf16>, vector<96x128xbf16>, vector<128x128xf32> -> vector<128x128xf32>
    %c0_3 = arith.constant 0 : index
    %c0_4 = arith.constant 0 : index
    %3 = vector.load %arg3[%c0_3, %c0_4] : memref<1x128xf32, #tpu.memory_space<vmem>>, vector<1x128xf32>
    %4 = vector.broadcast %3 : vector<1x128xf32> to vector<128x128xf32>
    %5 = arith.addf %2, %4 : vector<128x128xf32>
    %c0_5 = arith.constant 0 : index
    %c0_6 = arith.constant 0 : index
    %6 = vector.load %arg4[%c0_5, %c0_6] : memref<128x128xf32, #tpu.memory_space<vmem>>, vector<128x128xf32>
    tpu.vector_store %arg4[%c0_5, %c0_6], %5 {strides = array<i32>} : memref<128x128xf32, #tpu.memory_space<vmem>>, vector<128x128xf32>,
    return
  }
  func.func @transform_0(%arg0: i32) -> (i32, i32) {
    %c0_i32 = arith.constant 0 : i32
    %c0_i32_0 = arith.constant 0 : i32
    return %arg0, %c0_i32 : i32, i32
  }
  func.func @transform_1(%arg0: i32) -> (i32, i32) {
    %c0_i32 = arith.constant 0 : i32
    %c0_i32_0 = arith.constant 0 : i32
    %c0_i32_1 = arith.constant 0 : i32
    return %c0_i32, %c0_i32_0 : i32, i32
  }
  func.func @transform_2(%arg0: i32) -> (i32, i32) {
    %c0_i32 = arith.constant 0 : i32
    %c0_i32_0 = arith.constant 0 : i32
    %c0_i32_1 = arith.constant 0 : i32
    return %c0_i32, %c0_i32_0 : i32, i32
  }
  func.func @transform_3(%arg0: i32) -> (i32, i32) {
    %c0_i32 = arith.constant 0 : i32
    %c0_i32_0 = arith.constant 0 : i32
    return %arg0, %c0_i32 : i32, i32
  }
}

</mosaic_0001>

<bundles_post_ra>
// kernel: tpu_custom_call.1
= control target key start
LH: loop header
LB: loop body
LE: loop exit
PB: predicated region body
PF: predicated region fallthrough
CT: control target
= control target key end

     0   :  { %vm127_vm0 = vcmask 785408   ;;  %s487_s0 = inlined_call_operand.vmem [shape: bf16[128,96], index: 0, kind: input, shape index: {}]   ;;  %s488_s1 = inlined_call_operand.vmem [shape: bf16[96,128], index: 1, kind: input, shape index: {}]   ;;  %s489_s2 = inlined_call_operand.vmem [shape: f32[1,128], index: 2, kind: input, shape index: {}]   ;;  %s490_s3 = inlined_call_operand.hbm [shape: f32[128,128], index: 3, kind: output, shape index: {}]  }
   0x1   :  { %v361_v0 = vld [vmem:[%s488_s1] sm:$0xff]   ;;  %v362_v1 = vld [vmem:[%s488_s1 + $0x8] sm:$0xff]   ;;  %v363_v2 = vld [vmem:[%s488_s1 + $0x10] sm:$0xff]  }
   0x2   :  { %318 = vmatprep.subr.bf16.mxu0 %v361_v0  ;;  %346 = vmatprep.subr.bf16.mxu1 %v361_v0  ;;  %v367_v3 = vld [vmem:[%s487_s0] sm:$0xff]   ;;  %v364_v5 = vld [vmem:[%s488_s1 + $0x18] sm:$0xff]  }
   0x3   :  { %319 = vmatpush3.bf16.msra.mxu0 %v361_v0  ;;  %352 = vmatpush3.bf16.msra.mxu1 %v361_v0  ;;  %v368_v4 = vld [vmem:[%s487_s0 + $0x20] sm:$0xff]  }
   0x4   :  { %320 = vmatprep.subr.bf16.mxu0 %v362_v1  ;;  %347 = vmatprep.subr.bf16.mxu1 %v362_v1  ;;  %v365_v6 = vld [vmem:[%s488_s1 + $0x20] sm:$0xff]  }
   0x5   :  { %330 = vmatprep.mubr.msk.bf16.mxu0 %vm127_vm0, %v367_v3  ;;  %338 = vmatprep.mubr.msk.bf16.mxu1 %vm127_vm0, %v368_v4 }
   0x7   :  { %321 = vmatpush3.bf16.msra.mxu0 %v362_v1  ;;  %353 = vmatpush3.bf16.msra.mxu1 %v362_v1 }
   0x8   :  { %322 = vmatprep.subr.bf16.mxu0 %v363_v2  ;;  %348 = vmatprep.subr.bf16.mxu1 %v363_v2 }
   0xb   :  { %323 = vmatpush3.bf16.msra.mxu0 %v363_v2  ;;  %354 = vmatpush3.bf16.msra.mxu1 %v363_v2 }
   0xc   :  { %324 = vmatprep.subr.bf16.mxu0 %v364_v5  ;;  %349 = vmatprep.subr.bf16.mxu1 %v364_v5 }
   0xd   :  { %8 = vsyncpa [#allocation3], 0  ;;  %v366_v7 = vld [vmem:[%s488_s1 + $0x28] sm:$0xff]   ;;  %v371_v10 = vld [vmem:[%s487_s0 + $0x10] sm:$0xff]  }
   0xe   :  { %v369_v8 = vld [vmem:[%s487_s0 + $0x8] sm:$0xff]   ;;  %v372_v11 = vld [vmem:[%s487_s0 + $0x30] sm:$0xff]   ;;  %v373_v12 = vld [vmem:[%s487_s0 + $0x18] sm:$0xff]  }
   0xf   :  { %325 = vmatpush3.bf16.msra.mxu0 %v364_v5  ;;  %355 = vmatpush3.bf16.msra.mxu1 %v364_v5  ;;  %v370_v9 = vld [vmem:[%s487_s0 + $0x28] sm:$0xff]   ;;  %v374_v13 = vld [vmem:[%s487_s0 + $0x38] sm:$0xff]   ;;  %v281_v14 = vld [vmem:[%s489_s2] ss:$0 sm:$0xff]  ;;  %s399_s0 = smov [#allocation2]  }
  0x10   :  { %326 = vmatprep.subr.bf16.mxu0 %v365_v6  ;;  %350 = vmatprep.subr.bf16.mxu1 %v365_v6  ;;  %s270_s2 = sshll.u32 %s399_s0, 4  ;;  %s271_s2 = int_to_ptr.vmem [resolvable:$true] %s270_s2 }
  0x11   :  { %s375_s14 = scalar_lea.vmem %s271_s2, 2048  ;;  %p380_p1 = scmp.lt.s32.totalorder %s271_s2, %s271_s2 }
  0x12   :  { %p376_p0 = scmp.ne.s32.totalorder %s271_s2, %s375_s14  ;;  %p381_p2 = scmp.lt.s32.totalorder %s375_s14, %s375_s14 }
  0x13   :  { %327 = vmatpush3.bf16.msra.mxu0 %v365_v6  ;;  %356 = vmatpush3.bf16.msra.mxu1 %v365_v6 }
  0x14   :  { %328 = vmatprep.subr.bf16.mxu0 %v366_v7  ;;  %351 = vmatprep.subr.bf16.mxu1 %v366_v7  ;;  %p382_p3 = por %p381_p2, %p380_p1 }
  0x16   :  { %p383_p4 = pnand %p382_p3, %p376_p0 }
  0x17   :  { %329 = vmatpush3.bf16.msra.mxu0 %v366_v7  ;;  %357 = vmatpush3.bf16.msra.mxu1 %v366_v7 }
  0x1a   :  { %331 = vmatmul.mubr.msk.bf16.vlgmr.msra.gmra.mrb[0].mxu0 %vm127_vm0, %v369_v8  ;;  %339 = vmatmul.mubr.msk.bf16.vlgmr.msra.gmra.mrb[0].mxu1 %vm127_vm0, %v370_v9 }
  0x1b   :  { %334 = vmatprep.mubr.msk.bf16.mxu0 %vm127_vm0, %v371_v10  ;;  %342 = vmatprep.mubr.msk.bf16.mxu1 %vm127_vm0, %v372_v11 }
  0x22   :  { %335 = vmatmul.mubr.msk.bf16.gmra.mrb[4].mxu0 %vm127_vm0, %v373_v12  ;;  %343 = vmatmul.mubr.msk.bf16.gmra.mrb[4].mxu1 %vm127_vm0, %v374_v13 }
  0xed   :  { %v332_v15 = vpop.f32.mrb[0].mxu0  ;;  %v340_v16 = vpop.f32.mrb[0].mxu1 }
  0xee   :  { %v195_v17 = vadd.f32 %v332_v15, %v281_v14  ;;  %v227_v18 = vadd.f32 %v340_v16, %v281_v14  ;;  %v186_v19 = vpop.f32.mrb[1].mxu0  ;;  %v218_v20 = vpop.f32.mrb[1].mxu1 }
  0xef   :  { %v187_v21 = vadd.f32 %v281_v14, %v186_v19  ;;  %v219_v22 = vadd.f32 %v281_v14, %v218_v20  ;;  %v333_v23 = vpop.f32.mrb[2].mxu0  ;;  %v341_v24 = vpop.f32.mrb[2].mxu1 }
  0xf0   :  { %251 = vst [vmem:[#allocation2 + $0x10] sm:$0xff] %v195_v17  ;;  %259 = vst [vmem:[#allocation2 + $0x50] sm:$0xff] %v227_v18  ;;  %v198_v25 = vadd.f32 %v333_v23, %v281_v14  ;;  %v230_v26 = vadd.f32 %v341_v24, %v281_v14  ;;  %v189_v27 = vpop.f32.mrb[3].mxu0  ;;  %v221_v28 = vpop.f32.mrb[3].mxu1 }
  0xf1   :  { %249 = vst [vmem:[#allocation2] sm:$0xff] %v187_v21  ;;  %257 = vst [vmem:[#allocation2 + $0x40] sm:$0xff] %v219_v22  ;;  %v190_v29 = vadd.f32 %v281_v14, %v189_v27  ;;  %v222_v30 = vadd.f32 %v281_v14, %v221_v28 }
  0xf2   :  { %252 = vst [vmem:[#allocation2 + $0x18] sm:$0xff] %v198_v25  ;;  %260 = vst [vmem:[#allocation2 + $0x58] sm:$0xff] %v230_v26 }
  0xf3   :  { %250 = vst [vmem:[#allocation2 + $0x8] sm:$0xff] %v190_v29  ;;  %258 = vst [vmem:[#allocation2 + $0x48] sm:$0xff] %v222_v30 }
  0xf5   :  { %v336_v31 = vpop.f32.mrb[4].mxu0  ;;  %v344_v32 = vpop.f32.mrb[4].mxu1 }
  0xf6   :  { %v211_v33 = vadd.f32 %v336_v31, %v281_v14  ;;  %v243_v34 = vadd.f32 %v344_v32, %v281_v14  ;;  %v202_v35 = vpop.f32.mrb[5].mxu0  ;;  %v234_v36 = vpop.f32.mrb[5].mxu1 }
  0xf7   :  { %v203_v37 = vadd.f32 %v281_v14, %v202_v35  ;;  %v235_v38 = vadd.f32 %v281_v14, %v234_v36  ;;  %v337_v39 = vpop.f32.mrb[6].mxu0  ;;  %v345_v40 = vpop.f32.mrb[6].mxu1 }
  0xf8   :  { %255 = vst [vmem:[#allocation2 + $0x30] sm:$0xff] %v211_v33  ;;  %263 = vst [vmem:[#allocation2 + $0x70] sm:$0xff] %v243_v34  ;;  %v214_v41 = vadd.f32 %v337_v39, %v281_v14  ;;  %v246_v42 = vadd.f32 %v345_v40, %v281_v14  ;;  %v205_v43 = vpop.f32.mrb[7].mxu0  ;;  %v237_v44 = vpop.f32.mrb[7].mxu1 }
  0xf9   :  { %253 = vst [vmem:[#allocation2 + $0x20] sm:$0xff] %v203_v37  ;;  %261 = vst [vmem:[#allocation2 + $0x60] sm:$0xff] %v235_v38  ;;  %v206_v45 = vadd.f32 %v281_v14, %v205_v43  ;;  %v238_v46 = vadd.f32 %v281_v14, %v237_v44 }
  0xfa   :  { %256 = vst [vmem:[#allocation2 + $0x38] sm:$0xff] %v214_v41  ;;  %264 = vst [vmem:[#allocation2 + $0x78] sm:$0xff] %v246_v42 }
  0xfb   :  { %254 = vst [vmem:[#allocation2 + $0x28] sm:$0xff] %v206_v45  ;;  %262 = vst [vmem:[#allocation2 + $0x68] sm:$0xff] %v238_v46 }
  0xfc   :  { %386 = shalt.err (!%p383_p4)
}
  0xfd   :  { %s387_s17 = scalar_lea.hbm %s490_s3, 2048 }
  0xfe   :  { %p388_p5 = scmp.ne.s32.totalorder %s490_s3, %s387_s17  ;;  %p391_p6 = scmp.lt.u32.totalorder %s387_s17, %s490_s3 }
 0x100   :  { %p393_p7 = pnand %p391_p6, %p388_p5 }
 0x102   :  { %396 = shalt.err (!%p393_p7)
}
 0x103   :  { %s400_s22 = smov 128   ;;  %s401_s23 = smov 8  }
 0x104   :  { %276 = dma.vmem_to_hbm [thread:$0]  %s271_s2, 2048, %s490_s3, [#allocation3], %s400_s22, %s400_s22, %s401_s23  }
 0x105   :  { %397 = dma.done.wait [#allocation3], 2048  }
 0x106   :  { %398 = vsyncadd [#allocation3], 4294965248 }
 0x107   :  { %280 = vsyncpa [#allocation3], 1 }

</bundles_post_ra>
